<compile_context>
chip_gen: v7x
topology: tpu7x:2x2x1
jax: 0.10.0
libtpu: 0.0.40
codegen_flags: <defaults>
</compile_context>

<pallas_src>
import math

import jax
import jax.numpy as jnp
from jax.experimental import pallas as pl
from jax.experimental.pallas import tpu as pltpu


def _linear_e_kernel(x_ref, w_ref, b_ref, o_ref):
    # x_ref : (tm, tk) bf16   w_ref : (tn, tk) bf16   b_ref : (1, tn) f32
    # o_ref : (tm, tn) f32  -- VMEM-resident across k; doubles as accumulator.
    k = pl.program_id(2)

    # x @ W^T : contract last dims of both operands -> (tm, tn), f32 acc.
    part = jax.lax.dot_general(
        x_ref[...], w_ref[...],
        dimension_numbers=(((1,), (1,)), ((), ())),
        preferred_element_type=jnp.float32,
    )

    @pl.when(k == 0)
    def _():
        o_ref[...] = part            # first K block: no zero-fill needed

    @pl.when(k != 0)
    def _():
        o_ref[...] += part           # accumulate in place (f32)

    @pl.when(k == pl.num_programs(2) - 1)
    def _():
        o_ref[...] = o_ref[...] + b_ref[...]   # bias (NOT scaled)


def _cdiv(a, b):
    return -(-a // b)


def _round_up(a, m):
    return _cdiv(a, m) * m


def _pick_tile(dim, cap, align):
    """Tile size <= cap (cap a multiple of align), multiple of `align`,
    splitting `dim` into roughly equal blocks to minimize padding waste."""
    cap = max(cap, align)
    nblk = _cdiv(dim, cap)
    return min(_round_up(_cdiv(dim, nblk), align), _round_up(dim, align))


def linear_e_forward(x, weight, bias, *, tm=512, tn=512, tk=1024,
                     compute_dtype=jnp.bfloat16):
    """Pallas implementation of linear_e.forward.

    x      : (B, Cin)  float32
    weight : (Cout, Cin) float32   (PyTorch nn.Linear layout — NOT transposed)
    bias   : (Cout,) float32
    returns: (B, Cout) float32
    """
    B, Cin = x.shape
    Cout, Cin_w = weight.shape
    assert Cin == Cin_w

    scale = math.sqrt(2.0 / float(Cin))            # host-side scalar
    itemsize = jnp.dtype(compute_dtype).itemsize
    sub_align = 8 * (4 // itemsize)                # f32 -> 8, bf16 -> 16

    tm = _pick_tile(B, tm, sub_align)
    tn = _pick_tile(Cout, tn, 128)                 # lane-dense output tiles
    tk = _pick_tile(Cin, tk, 128)

    M = _round_up(B, tm)
    N = _round_up(Cout, tn)
    K = _round_up(Cin, tk)

    # v7x has 2 TensorCores; "parallel" axes only shard if they have >1 block.
    if (M // tm) == 1 and (N // tn) == 1 and tn % 256 == 0:
        tn //= 2                                   # N stays divisible by tn

    # One fused wrapper pass over W: equalized-LR scale + bf16 cast + pad.
    # Layout stays (Cout, Cin) -> no transpose copy.
    w_p = (weight * scale).astype(compute_dtype)
    if N != Cout or K != Cin:
        w_p = jnp.pad(w_p, ((0, N - Cout), (0, K - Cin)))

    x_p = x.astype(compute_dtype)
    if M != B or K != Cin:
        x_p = jnp.pad(x_p, ((0, M - B), (0, K - Cin)))

    b_p = bias.astype(jnp.float32)
    if N != Cout:
        b_p = jnp.pad(b_p, (0, N - Cout))
    b2d = b_p.reshape(1, N)

    grid = (M // tm, N // tn, K // tk)

    out = pl.pallas_call(
        _linear_e_kernel,
        out_shape=jax.ShapeDtypeStruct((M, N), jnp.float32),
        grid_spec=pltpu.PrefetchScalarGridSpec(
            num_scalar_prefetch=0,
            grid=grid,
            in_specs=[
                pl.BlockSpec((tm, tk), lambda i, j, k: (i, k)),  # x tile
                pl.BlockSpec((tn, tk), lambda i, j, k: (j, k)),  # W tile (untransposed)
                pl.BlockSpec((1, tn), lambda i, j, k: (0, j)),   # bias tile
            ],
            out_specs=pl.BlockSpec((tm, tn), lambda i, j, k: (i, j)),
        ),
        compiler_params=pltpu.CompilerParams(
            dimension_semantics=("parallel", "parallel", "arbitrary"),
            vmem_limit_bytes=32 * 1024 * 1024,      # safe on v5e/v6e/v7x
        ),
        cost_estimate=pl.CostEstimate(
            flops=2 * M * N * K,
            transcendentals=0,
            bytes_accessed=(M * K + N * K) * itemsize + (M * N + N) * 4,
        ),
    )(x_p, w_p, b2d)

    if M != B or N != Cout:
        out = out[:B, :Cout]
    if out.dtype != x.dtype:
        out = out.astype(x.dtype)
    return out


def _reference(x, weight, bias, cin):
    scale = math.sqrt(2.0 / float(cin))
    return x @ (weight * scale).T + bias


if __name__ == "__main__":
    key = jax.random.PRNGKey(0)
    k1, k2, k3, k4, k5, k6 = jax.random.split(key, 6)

    # bf16 operands / f32 accumulate -> bf16-level tolerances.
    ATOL, RTOL = 5e-2, 2e-2

    # --- 1) Small, module-consistent shapes: batch=8, input_c=32, output_c=64
    B, CIN, COUT = 8, 32, 64
    x = jax.random.normal(k1, (B, CIN), dtype=jnp.float32)
    w = jax.random.normal(k2, (COUT, CIN), dtype=jnp.float32)
    b = jnp.zeros((COUT,), dtype=jnp.float32)

    out = jax.block_until_ready(linear_e_forward(x, w, b))
    ref = _reference(x, w, b, CIN)
    assert out.shape == (B, COUT)
    assert jnp.allclose(out, ref, atol=ATOL, rtol=RTOL)

    # --- 2) Multi-block grid (2,3,4): exercises K accumulation + bias epilogue
    B2, CIN2, COUT2 = 64, 512, 384
    x2 = jax.random.normal(k3, (B2, CIN2), dtype=jnp.float32)
    w2 = jax.random.normal(k4, (COUT2, CIN2), dtype=jnp.float32)
    b2 = 0.1 * jax.random.normal(k5, (COUT2,), dtype=jnp.float32)

    out2 = jax.block_until_ready(
        linear_e_forward(x2, w2, b2, tm=32, tn=128, tk=128))
    ref2 = _reference(x2, w2, b2, CIN2)
    assert out2.shape == (B2, COUT2)
    assert jnp.allclose(out2, ref2, atol=ATOL, rtol=RTOL)

    # --- 3) Ragged batch + default tiles: exercises adaptive tm (304) and the
    #        v7x >=2-parallel-blocks split (tn 512 -> 256).
    B3, CIN3, COUT3 = 300, 1024, 512
    x3 = jax.random.normal(k6, (B3, CIN3), dtype=jnp.float32)
    w3 = jax.random.normal(k2, (COUT3, CIN3), dtype=jnp.float32)
    b3 = jnp.zeros((COUT3,), dtype=jnp.float32)

    out3 = jax.block_until_ready(linear_e_forward(x3, w3, b3))
    ref3 = _reference(x3, w3, b3, CIN3)
    assert out3.shape == (B3, COUT3)
    assert jnp.allclose(out3, ref3, atol=ATOL, rtol=RTOL)

    print("KERNEL_OK")
</pallas_src>

<mosaic_0001>
module attributes {stable_mosaic.version = 11 : i64} {
  func.func @_linear_e_kernel(%arg0: i32, %arg1: i32, %arg2: i32, %arg3: memref<16x128xbf16, #tpu.memory_space<vmem>>, %arg4: memref<128x128xbf16, #tpu.memory_space<vmem>>, %arg5: memref<1x128xf32, #tpu.memory_space<vmem>>, %arg6: memref<16x128xf32, #tpu.memory_space<vmem>>) attributes {dimension_semantics = [#tpu.dimension_semantics<parallel>, #tpu.dimension_semantics<parallel>, #tpu.dimension_semantics<arbitrary>], iteration_bounds = array<i64: 1, 1, 1>, scalar_prefetch = 0 : i64, scratch_operands = 0 : i64, tpu.core_type = #tpu.core_type<tc>, window_params = [{transform_indices = @transform_0, window_bounds = array<i64: 16, 128>}, {transform_indices = @transform_1, window_bounds = array<i64: 128, 128>}, {transform_indices = @transform_2, window_bounds = array<i64: 1, 128>}, {transform_indices = @transform_3, window_bounds = array<i64: 16, 128>}]} {
    %c0 = arith.constant 0 : index
    %c0_0 = arith.constant 0 : index
    %0 = vector.load %arg3[%c0, %c0_0] : memref<16x128xbf16, #tpu.memory_space<vmem>>, vector<16x128xbf16>
    %c0_1 = arith.constant 0 : index
    %c0_2 = arith.constant 0 : index
    %1 = vector.load %arg4[%c0_1, %c0_2] : memref<128x128xbf16, #tpu.memory_space<vmem>>, vector<128x128xbf16>
    %cst = arith.constant dense<0.000000e+00> : vector<16x128xf32>
    %2 = tpu.matmul %0, %1, %cst {dimension_numbers = #tpu.dot_dimension_numbers<[1], [1], [0], [0], [0, 0, 1, 0], [], []>} : vector<16x128xbf16>, vector<128x128xbf16>, vector<16x128xf32> -> vector<16x128xf32>
    %c0_i32 = arith.constant 0 : i32
    %3 = arith.cmpi eq, %arg2, %c0_i32 : i32
    %4 = arith.extui %3 : i1 to i32
    %c0_i32_3 = arith.constant 0 : i32
    %5 = arith.cmpi ne, %4, %c0_i32_3 : i32
    scf.if %5 {
      %c0_8 = arith.constant 0 : index
      %c0_9 = arith.constant 0 : index
      %12 = vector.load %arg6[%c0_8, %c0_9] : memref<16x128xf32, #tpu.memory_space<vmem>>, vector<16x128xf32>
      tpu.vector_store %arg6[%c0_8, %c0_9], %2 {strides = array<i32>} : memref<16x128xf32, #tpu.memory_space<vmem>>, vector<16x128xf32>,
    } else {
    }
    %c0_i32_4 = arith.constant 0 : i32
    %6 = arith.cmpi ne, %arg2, %c0_i32_4 : i32
    %7 = arith.extui %6 : i1 to i32
    %c0_i32_5 = arith.constant 0 : i32
    %8 = arith.cmpi ne, %7, %c0_i32_5 : i32
    scf.if %8 {
      %c0_8 = arith.constant 0 : index
      %c0_9 = arith.constant 0 : index
      %12 = vector.load %arg6[%c0_8, %c0_9] : memref<16x128xf32, #tpu.memory_space<vmem>>, vector<16x128xf32>
      %13 = arith.addf %12, %2 : vector<16x128xf32>
      %c0_10 = arith.constant 0 : index
      %c0_11 = arith.constant 0 : index
      %14 = vector.load %arg6[%c0_10, %c0_11] : memref<16x128xf32, #tpu.memory_space<vmem>>, vector<16x128xf32>
      tpu.vector_store %arg6[%c0_10, %c0_11], %13 {strides = array<i32>} : memref<16x128xf32, #tpu.memory_space<vmem>>, vector<16x128xf32>,
    } else {
    }
    %c0_i32_6 = arith.constant 0 : i32
    %9 = arith.cmpi eq, %arg2, %c0_i32_6 : i32
    %10 = arith.extui %9 : i1 to i32
    %c0_i32_7 = arith.constant 0 : i32
    %11 = arith.cmpi ne, %10, %c0_i32_7 : i32
    scf.if %11 {
      %c0_8 = arith.constant 0 : index
      %c0_9 = arith.constant 0 : index
      %12 = vector.load %arg6[%c0_8, %c0_9] : memref<16x128xf32, #tpu.memory_space<vmem>>, vector<16x128xf32>
      %c0_10 = arith.constant 0 : index
      %c0_11 = arith.constant 0 : index
      %13 = vector.load %arg5[%c0_10, %c0_11] : memref<1x128xf32, #tpu.memory_space<vmem>>, vector<1x128xf32>
      %14 = vector.broadcast %13 : vector<1x128xf32> to vector<16x128xf32>
      %15 = arith.addf %12, %14 : vector<16x128xf32>
      %c0_12 = arith.constant 0 : index
      %c0_13 = arith.constant 0 : index
      %16 = vector.load %arg6[%c0_12, %c0_13] : memref<16x128xf32, #tpu.memory_space<vmem>>, vector<16x128xf32>
      tpu.vector_store %arg6[%c0_12, %c0_13], %15 {strides = array<i32>} : memref<16x128xf32, #tpu.memory_space<vmem>>, vector<16x128xf32>,
    } else {
    }
    return
  }
  func.func @transform_0(%arg0: i32, %arg1: i32, %arg2: i32) -> (i32, i32) {
    %c0_i32 = arith.constant 0 : i32
    return %arg0, %arg2 : i32, i32
  }
  func.func @transform_1(%arg0: i32, %arg1: i32, %arg2: i32) -> (i32, i32) {
    %c0_i32 = arith.constant 0 : i32
    return %arg1, %arg2 : i32, i32
  }
  func.func @transform_2(%arg0: i32, %arg1: i32, %arg2: i32) -> (i32, i32) {
    %c0_i32 = arith.constant 0 : i32
    %c0_i32_0 = arith.constant 0 : i32
    return %c0_i32, %arg1 : i32, i32
  }
  func.func @transform_3(%arg0: i32, %arg1: i32, %arg2: i32) -> (i32, i32) {
    %c0_i32 = arith.constant 0 : i32
    return %arg0, %arg1 : i32, i32
  }
}

</mosaic_0001>

<bundles_post_ra>
// kernel: tpu_custom_call.1
= control target key start
LH: loop header
LB: loop body
LE: loop exit
PB: predicated region body
PF: predicated region fallthrough
CT: control target
= control target key end

     0   :  { %8 = vsyncpa [#allocation3], 0  ;;  %s404_s0 = inlined_call_operand.hbm [shape: bf16[16,128], index: 0, kind: input, shape index: {}]   ;;  %s405_s1 = inlined_call_operand.hbm [shape: bf16[128,128], index: 1, kind: input, shape index: {}]   ;;  %s406_s2 = inlined_call_operand.vmem [shape: f32[1,128], index: 2, kind: input, shape index: {}]   ;;  %s407_s3 = inlined_call_operand.hbm [shape: f32[16,128], index: 3, kind: output, shape index: {}]  }
   0x1   :  { %9 = vsyncpa [#allocation6], 0 }
   0x2   :  { %10 = vsyncpa [#allocation4], 0  ;;  %s336_s12 = smov [#allocation2]   ;;  %s264_s16 = scalar_lea.hbm %s404_s0, 128 }
   0x3   :  { %s16_s13 = sshll.u32 %s336_s12, 4  ;;  %p265_p0 = scmp.ne.s32.totalorder %s404_s0, %s264_s16  ;;  %s17_s13 = int_to_ptr.vmem [resolvable:$true] %s16_s13 }
   0x4   :  { %p268_p1 = scmp.lt.u32.totalorder %s264_s16, %s404_s0 }
   0x6   :  { %p270_p2 = pnand %p268_p1, %p265_p0 }
   0x8   :  { %273 = shalt.err (!%p270_p2)
}
   0x9   :  { %s274_s21 = scalar_lea.vmem %s17_s13, 128  ;;  %p279_p4 = scmp.lt.s32.totalorder %s17_s13, %s17_s13 }
   0xa   :  { %p275_p3 = scmp.ne.s32.totalorder %s17_s13, %s274_s21  ;;  %p280_p5 = scmp.lt.s32.totalorder %s274_s21, %s274_s21 }
   0xc   :  { %p281_p6 = por %p280_p5, %p279_p4 }
   0xe   :  { %p282_p7 = pnand %p281_p6, %p275_p3 }
  0x10   :  { %285 = shalt.err (!%p282_p7)
}
  0x11   :  { %s337_s22 = smov 64   ;;  %s338_s23 = smov 4  }
  0x12   :  { %22 = dma.hbm_to_vmem [thread:$0]  %s404_s0, 128, %s17_s13, [#allocation3], %s337_s22, %s337_s22, %s338_s23  }
  0x13   :  { %s339_s26 = smov [#allocation5]   ;;  %s286_s30 = scalar_lea.hbm %s405_s1, 1024 }
  0x14   :  { %s28_s27 = sshll.u32 %s339_s26, 4  ;;  %p287_p8 = scmp.ne.s32.totalorder %s405_s1, %s286_s30  ;;  %s29_s27 = int_to_ptr.vmem [resolvable:$true] %s28_s27 }
  0x15   :  { %p290_p9 = scmp.lt.u32.totalorder %s286_s30, %s405_s1 }
  0x17   :  { %p292_p10 = pnand %p290_p9, %p287_p8 }
  0x19   :  { %295 = shalt.err (!%p292_p10)
}
  0x1a   :  { %s296_s8 = scalar_lea.vmem %s29_s27, 1024  ;;  %p301_p12 = scmp.lt.s32.totalorder %s29_s27, %s29_s27 }
  0x1b   :  { %p297_p11 = scmp.ne.s32.totalorder %s29_s27, %s296_s8  ;;  %p302_p13 = scmp.lt.s32.totalorder %s296_s8, %s296_s8 }
  0x1d   :  { %p303_p0 = por %p302_p13, %p301_p12 }
  0x1f   :  { %p304_p1 = pnand %p303_p0, %p297_p11 }
  0x21   :  { %307 = shalt.err (!%p304_p1)
}
  0x22   :  { %34 = dma.hbm_to_vmem [thread:$0]  %s405_s1, 1024, %s29_s27, [#allocation6], %s337_s22, %s337_s22, %s338_s23  }
  0x23   :  { %330 = dma.done.wait [#allocation3], 128  }
  0x24   :  { %331 = vsyncadd [#allocation3], 4294967168 }
  0x25   :  { %332 = dma.done.wait [#allocation6], 1024  }
  0x26   :  { %333 = vsyncadd [#allocation6], 4294966272  ;;  %v340_v0 = vmov 0.0   ;;  %vm341_vm0 = vmmov 0   ;;  %v255_v1 = vld [vmem:[#allocation5] sm:$0xff]   ;;  %v256_v2 = vld [vmem:[#allocation5 + $0x8] sm:$0xff]  }
  0x27   :  { %226 = vmatprep.subr.bf16.mxu0 %v340_v0  ;;  %242 = vmatprep.mubr.msk.bf16.mxu0 %vm341_vm0, %v340_v0  ;;  %v257_v3 = vld [vmem:[#allocation5 + $0x10] sm:$0xff]   ;;  %v258_v4 = vld [vmem:[#allocation5 + $0x18] sm:$0xff]   ;;  %v259_v5 = vld [vmem:[#allocation5 + $0x20] sm:$0xff]   ;;  %s342_s11 = smov [#allocation7]  }
  0x28   :  { %227 = vmatpush3.bf16.xpose.msra.mxu0 %v255_v1  ;;  %v260_v6 = vld [vmem:[#allocation5 + $0x28] sm:$0xff]   ;;  %v261_v7 = vld [vmem:[#allocation5 + $0x30] sm:$0xff]   ;;  %v262_v8 = vld [vmem:[#allocation5 + $0x38] sm:$0xff]   ;;  %s194_s12 = sshll.u32 %s342_s11, 4  ;;  %s195_s12 = int_to_ptr.vmem [resolvable:$true] %s194_s12 }
  0x29   :  { %228 = vmatprep.subr.bf16.mxu0 %v340_v0  ;;  %v263_v9 = vld [vmem:[#allocation2] sm:$0xff]   ;;  %s308_s13 = scalar_lea.vmem %s195_s12, 256  ;;  %p313_p3 = scmp.lt.s32.totalorder %s195_s12, %s195_s12 }
  0x2a   :  { %v216_v10 = vld [vmem:[%s406_s2] ss:$0 sm:$0xff]  ;;  %p309_p2 = scmp.ne.s32.totalorder %s195_s12, %s308_s13  ;;  %p314_p4 = scmp.lt.s32.totalorder %s308_s13, %s308_s13 }
  0x2c   :  { %p315_p5 = por %p314_p4, %p313_p3 }
  0x2e   :  { %p316_p6 = pnand %p315_p5, %p309_p2 }
  0x30   :  { %229 = vmatpush3.bf16.xpose.msra.mxu0 %v256_v2 }
  0x31   :  { %230 = vmatprep.subr.bf16.mxu0 %v340_v0 }
  0x38   :  { %231 = vmatpush3.bf16.xpose.msra.mxu0 %v257_v3 }
  0x39   :  { %232 = vmatprep.subr.bf16.mxu0 %v340_v0 }
  0x40   :  { %233 = vmatpush3.bf16.xpose.msra.mxu0 %v258_v4 }
  0x41   :  { %234 = vmatprep.subr.bf16.mxu0 %v340_v0 }
  0x48   :  { %235 = vmatpush3.bf16.xpose.msra.mxu0 %v259_v5 }
  0x49   :  { %236 = vmatprep.subr.bf16.mxu0 %v340_v0 }
  0x50   :  { %237 = vmatpush3.bf16.xpose.msra.mxu0 %v260_v6 }
  0x51   :  { %238 = vmatprep.subr.bf16.mxu0 %v340_v0 }
  0x58   :  { %239 = vmatpush3.bf16.xpose.msra.mxu0 %v261_v7 }
  0x59   :  { %240 = vmatprep.subr.bf16.mxu0 %v340_v0 }
  0x60   :  { %241 = vmatpush3.bf16.xpose.msra.mxu0 %v262_v8 }
  0x67   :  { %243 = vmatmul.mubr.bf16.vlgmr.msra.gmra.mrb[0].mxu0 %v263_v9 }
 0x13a   :  { %v150_v11 = vpop.f32.mrb[0].mxu0 }
 0x13b   :  { %v185_v12 = vadd.f32 %v216_v10, %v150_v11  ;;  %v244_v13 = vpop.f32.mrb[1].mxu0 }
 0x13c   :  { %v153_v14 = vpop.f32.mrb[2].mxu0 }
 0x13d   :  { %187 = vst [vmem:[#allocation7] sm:$0xff] %v185_v12  ;;  %v186_v15 = vadd.f32 %v216_v10, %v153_v14  ;;  %v245_v16 = vpop.f32.mrb[3].mxu0 }
 0x13f   :  { %188 = vst [vmem:[#allocation7 + $0x8] sm:$0xff] %v186_v15 }
 0x140   :  { %319 = shalt.err (!%p316_p6)
}
 0x141   :  { %s320_s15 = scalar_lea.hbm %s407_s3, 256 }
 0x142   :  { %p321_p7 = scmp.ne.s32.totalorder %s407_s3, %s320_s15  ;;  %p324_p8 = scmp.lt.u32.totalorder %s320_s15, %s407_s3 }
 0x144   :  { %p326_p9 = pnand %p324_p8, %p321_p7 }
 0x146   :  { %329 = shalt.err (!%p326_p9)
}
 0x147   :  { %s343_s20 = smov 128   ;;  %s344_s21 = smov 8  }
 0x148   :  { %200 = dma.vmem_to_hbm [thread:$0]  %s195_s12, 256, %s407_s3, [#allocation4], %s343_s20, %s343_s20, %s344_s21  }
 0x149   :  { %334 = dma.done.wait [#allocation4], 256  }
 0x14a   :  { %335 = vsyncadd [#allocation4], 4294967040 }
 0x14b   :  { %204 = vsyncpa [#allocation3], 1 }
 0x14c   :  { %205 = vsyncpa [#allocation6], 1 }
 0x14d   :  { %206 = vsyncpa [#allocation4], 1 }

</bundles_post_ra>
